<compile_context>
chip_gen: v6e
topology: v6e:2x2x1
jax: 0.10.0
libtpu: 0.0.40
codegen_flags: <defaults>
</compile_context>

<pallas_src>
import functools

import jax
import jax.numpy as jnp
from jax.experimental import pallas as pl
from jax.experimental.pallas import tpu as pltpu

_LANES = 128
_SUBLANES = 8
# 512 rows x 128 lanes x 4 coords x 4 B = 1 MiB per input block
# -> 2 inputs x 2 pipeline buffers ~= 4 MiB, safe on v5e/v6e/v7x defaults.
_MAX_TILE_ROWS = 512


def _giou_elementwise(pred_ref, tgt_ref, eps):
    """Per-box GIoU loss on dense (TR, 128) coordinate planes."""
    px1, py1, px2, py2 = pred_ref[0], pred_ref[1], pred_ref[2], pred_ref[3]
    tx1, ty1, tx2, ty2 = tgt_ref[0], tgt_ref[1], tgt_ref[2], tgt_ref[3]

    # intersection
    iw = jnp.maximum(jnp.minimum(px2, tx2) - jnp.maximum(px1, tx1) + 1.0, 0.0)
    ih = jnp.maximum(jnp.minimum(py2, ty2) - jnp.maximum(py1, ty1) + 1.0, 0.0)
    overlap = iw * ih

    # areas / union / iou
    ap = (px2 - px1 + 1.0) * (py2 - py1 + 1.0)
    ag = (tx2 - tx1 + 1.0) * (ty2 - ty1 + 1.0)
    union = ap + ag - overlap + eps
    ious = overlap / union

    # smallest enclosing box
    ew = jnp.maximum(jnp.maximum(px2, tx2) - jnp.minimum(px1, tx1) + 1.0, 0.0)
    eh = jnp.maximum(jnp.maximum(py2, ty2) - jnp.minimum(py1, ty1) + 1.0, 0.0)
    enclose = ew * eh + eps

    gious = ious - (enclose - union) / enclose
    return 1.0 - gious


# ----- elementwise kernels (reduction='none') -----
def _loss_kernel(eps, pred_ref, tgt_ref, loss_ref):
    loss_ref[...] = _giou_elementwise(pred_ref, tgt_ref, eps)


def _loss_w_kernel(eps, pred_ref, tgt_ref, w_ref, loss_ref):
    loss_ref[...] = _giou_elementwise(pred_ref, tgt_ref, eps) * w_ref[...]


# ----- sum kernels (reduction='mean'/'sum'): per-tile (8,128) partial sums -----
def _sum_kernel(eps, n, tile_rows, pred_ref, tgt_ref, psum_ref):
    loss = _giou_elementwise(pred_ref, tgt_ref, eps)
    # mask lane/row padding: global box index = (pid*TR + r)*128 + c
    base = pl.program_id(0) * (tile_rows * _LANES)
    r = jax.lax.broadcasted_iota(jnp.int32, (tile_rows, _LANES), 0)
    c = jax.lax.broadcasted_iota(jnp.int32, (tile_rows, _LANES), 1)
    loss = jnp.where(base + r * _LANES + c < n, loss, 0.0)
    partial = jnp.sum(
        loss.reshape(tile_rows // _SUBLANES, _SUBLANES, _LANES), axis=0)
    psum_ref[...] = partial.reshape(1, _SUBLANES, _LANES)


def _sum_w_kernel(eps, tile_rows, pred_ref, tgt_ref, w_ref, psum_ref):
    # weight is zero-padded in the wrapper, so it also masks padded boxes
    loss = _giou_elementwise(pred_ref, tgt_ref, eps) * w_ref[...]
    partial = jnp.sum(
        loss.reshape(tile_rows // _SUBLANES, _SUBLANES, _LANES), axis=0)
    psum_ref[...] = partial.reshape(1, _SUBLANES, _LANES)


def _pack_boxes(boxes, n, npad, rpad):
    b = jnp.transpose(boxes.astype(jnp.float32))          # (4, n)
    b = jnp.pad(b, ((0, 0), (0, npad - n)))                # (4, npad)
    return b.reshape(4, rpad, _LANES)                      # (4, R, 128)


def giou_loss_pallas(pred, target, weight=None, avg_factor=None,
                     reduction='mean', loss_weight=1.0, eps=1e-6):
    """Matches GIoULoss.forward semantics for (n, 4) float boxes.

    weight, if given, must be per-box of shape (n,).
    """
    assert reduction in ('none', 'mean', 'sum')
    n = pred.shape[0]
    rows = pl.cdiv(n, _LANES)
    tile_rows = min(_MAX_TILE_ROWS,
                    max(_SUBLANES, pl.cdiv(rows, _SUBLANES) * _SUBLANES))
    num_tiles = pl.cdiv(rows, tile_rows)
    rpad = num_tiles * tile_rows
    npad = rpad * _LANES

    pred_t = _pack_boxes(pred, n, npad, rpad)
    tgt_t = _pack_boxes(target, n, npad, rpad)
    if weight is not None:
        w_t = jnp.pad(weight.astype(jnp.float32),
                      (0, npad - n)).reshape(rpad, _LANES)

    box_spec = pl.BlockSpec((4, tile_rows, _LANES), lambda i: (0, i, 0))
    plane_spec = pl.BlockSpec((tile_rows, _LANES), lambda i: (i, 0))
    cparams = pltpu.CompilerParams(dimension_semantics=("parallel",))
    eps = float(eps)

    if reduction == 'none':
        out_shape = jax.ShapeDtypeStruct((rpad, _LANES), jnp.float32)
        if weight is None:
            loss_full = pl.pallas_call(
                functools.partial(_loss_kernel, eps),
                out_shape=out_shape,
                grid=(num_tiles,),
                in_specs=[box_spec, box_spec],
                out_specs=plane_spec,
                compiler_params=cparams,
            )(pred_t, tgt_t)
        else:
            loss_full = pl.pallas_call(
                functools.partial(_loss_w_kernel, eps),
                out_shape=out_shape,
                grid=(num_tiles,),
                in_specs=[box_spec, box_spec, plane_spec],
                out_specs=plane_spec,
                compiler_params=cparams,
            )(pred_t, tgt_t, w_t)
        # TODO(synk): the data-dependent "no positive weight" early-return of
        # GIoULoss.forward returns a scalar even for reduction='none'; that
        # shape-polymorphic branch is not reproduced here.
        return loss_weight * loss_full.reshape(-1)[:n]

    # 'mean' / 'sum': per-tile partial sums only, no per-box loss writeback.
    psum_shape = jax.ShapeDtypeStruct((num_tiles, _SUBLANES, _LANES),
                                      jnp.float32)
    psum_spec = pl.BlockSpec((1, _SUBLANES, _LANES), lambda i: (i, 0, 0))
    if weight is None:
        psums = pl.pallas_call(
            functools.partial(_sum_kernel, eps, n, tile_rows),
            out_shape=psum_shape,
            grid=(num_tiles,),
            in_specs=[box_spec, box_spec],
            out_specs=psum_spec,
            compiler_params=cparams,
        )(pred_t, tgt_t)
    else:
        psums = pl.pallas_call(
            functools.partial(_sum_w_kernel, eps, tile_rows),
            out_shape=psum_shape,
            grid=(num_tiles,),
            in_specs=[box_spec, box_spec, plane_spec],
            out_specs=psum_spec,
            compiler_params=cparams,
        )(pred_t, tgt_t, w_t)

    total = jnp.sum(psums)
    if reduction == 'sum':
        out = loss_weight * total
    else:  # 'mean'
        denom = (jnp.asarray(n, jnp.float32) if avg_factor is None
                 else jnp.asarray(avg_factor, jnp.float32))
        out = loss_weight * total / denom

    if weight is not None:
        # GIoULoss.forward early-return when no weight is positive.
        fallback = jnp.sum(pred.astype(jnp.float32)
                           * weight.astype(jnp.float32)[:, None])
        out = jnp.where(jnp.any(weight > 0), out, fallback)
    return out


def _giou_loss_ref(pred, target, eps=1e-6):
    # pure-JAX reference of the PyTorch giou_loss (element='none')
    lt = jnp.maximum(pred[:, :2], target[:, :2])
    rb = jnp.minimum(pred[:, 2:], target[:, 2:])
    wh = jnp.clip(rb - lt + 1.0, 0.0)
    overlap = wh[:, 0] * wh[:, 1]
    ap = (pred[:, 2] - pred[:, 0] + 1.0) * (pred[:, 3] - pred[:, 1] + 1.0)
    ag = (target[:, 2] - target[:, 0] + 1.0) * (target[:, 3] - target[:, 1] + 1.0)
    union = ap + ag - overlap + eps
    ious = overlap / union
    e_lt = jnp.minimum(pred[:, :2], target[:, :2])
    e_rb = jnp.maximum(pred[:, 2:], target[:, 2:])
    e_wh = jnp.clip(e_rb - e_lt + 1.0, 0.0)
    e_area = e_wh[:, 0] * e_wh[:, 1] + eps
    gious = ious - (e_area - union) / e_area
    return 1.0 - gious


def _make_boxes(key, n):
    k1, k2 = jax.random.split(key)
    xy = jax.random.uniform(k1, (n, 2), jnp.float32, 0.0, 32.0)
    wh = jax.random.uniform(k2, (n, 2), jnp.float32, 1.0, 16.0)
    return jnp.concatenate([xy, xy + wh], axis=1)  # valid (x1,y1,x2,y2)


if __name__ == "__main__":
    key = jax.random.PRNGKey(0)
    kp, kt, kw, kp2, kt2 = jax.random.split(key, 5)

    # small case: default GIoULoss() -> eps=1e-6, reduction='mean'
    n = 8
    pred = _make_boxes(kp, n)
    target = _make_boxes(kt, n)
    ref_elem = _giou_loss_ref(pred, target, eps=1e-6)

    loss_mean = jax.block_until_ready(
        giou_loss_pallas(pred, target, reduction='mean', eps=1e-6))
    assert jnp.allclose(loss_mean, jnp.mean(ref_elem), rtol=1e-5, atol=1e-5), \
        (loss_mean, jnp.mean(ref_elem))

    loss_sum = jax.block_until_ready(
        giou_loss_pallas(pred, target, reduction='sum', eps=1e-6))
    assert jnp.allclose(loss_sum, jnp.sum(ref_elem), rtol=1e-5, atol=1e-5)

    loss_none = jax.block_until_ready(
        giou_loss_pallas(pred, target, reduction='none', eps=1e-6))
    assert loss_none.shape == (n,)
    assert jnp.allclose(loss_none, ref_elem, rtol=1e-5, atol=1e-5)

    # weighted mean
    w = jax.random.uniform(kw, (n,), jnp.float32, 0.1, 2.0)
    loss_wmean = jax.block_until_ready(
        giou_loss_pallas(pred, target, weight=w, reduction='mean', eps=1e-6))
    assert jnp.allclose(loss_wmean, jnp.mean(ref_elem * w), rtol=1e-5, atol=1e-5)

    # non-multiple-of-128 case exercising the padding mask on the sum path
    n2 = 300
    pred2 = _make_boxes(kp2, n2)
    target2 = _make_boxes(kt2, n2)
    ref2 = _giou_loss_ref(pred2, target2, eps=1e-6)
    loss_sum2 = jax.block_until_ready(
        giou_loss_pallas(pred2, target2, reduction='sum', eps=1e-6))
    assert jnp.allclose(loss_sum2, jnp.sum(ref2), rtol=1e-4, atol=1e-4)

    print("KERNEL_OK")
</pallas_src>

<mosaic_0001>
module attributes {stable_mosaic.version = 11 : i64} {
  func.func @_sum_kernel(%arg0: i32, %arg1: memref<4x8x128xf32, #tpu.memory_space<vmem>>, %arg2: memref<4x8x128xf32, #tpu.memory_space<vmem>>, %arg3: memref<1x8x128xf32, #tpu.memory_space<vmem>>) attributes {dimension_semantics = [#tpu.dimension_semantics<parallel>], iteration_bounds = array<i64: 1>, scalar_prefetch = 0 : i64, scratch_operands = 0 : i64, tpu.core_type = #tpu.core_type<tc>, window_params = [{transform_indices = @transform_0, window_bounds = array<i64: 4, 8, 128>}, {transform_indices = @transform_1, window_bounds = array<i64: 4, 8, 128>}, {transform_indices = @transform_2, window_bounds = array<i64: 1, 8, 128>}]} {
    %c0 = arith.constant 0 : index
    %c0_0 = arith.constant 0 : index
    %c0_1 = arith.constant 0 : index
    %0 = vector.load %arg1[%c0, %c0_0, %c0_1] : memref<4x8x128xf32, #tpu.memory_space<vmem>>, vector<1x8x128xf32>
    %1 = vector.shape_cast %0 : vector<1x8x128xf32> to vector<8x128xf32>
    %c1 = arith.constant 1 : index
    %c0_2 = arith.constant 0 : index
    %c0_3 = arith.constant 0 : index
    %2 = vector.load %arg1[%c1, %c0_2, %c0_3] : memref<4x8x128xf32, #tpu.memory_space<vmem>>, vector<1x8x128xf32>
    %3 = vector.shape_cast %2 : vector<1x8x128xf32> to vector<8x128xf32>
    %c2 = arith.constant 2 : index
    %c0_4 = arith.constant 0 : index
    %c0_5 = arith.constant 0 : index
    %4 = vector.load %arg1[%c2, %c0_4, %c0_5] : memref<4x8x128xf32, #tpu.memory_space<vmem>>, vector<1x8x128xf32>
    %5 = vector.shape_cast %4 : vector<1x8x128xf32> to vector<8x128xf32>
    %c3 = arith.constant 3 : index
    %c0_6 = arith.constant 0 : index
    %c0_7 = arith.constant 0 : index
    %6 = vector.load %arg1[%c3, %c0_6, %c0_7] : memref<4x8x128xf32, #tpu.memory_space<vmem>>, vector<1x8x128xf32>
    %7 = vector.shape_cast %6 : vector<1x8x128xf32> to vector<8x128xf32>
    %c0_8 = arith.constant 0 : index
    %c0_9 = arith.constant 0 : index
    %c0_10 = arith.constant 0 : index
    %8 = vector.load %arg2[%c0_8, %c0_9, %c0_10] : memref<4x8x128xf32, #tpu.memory_space<vmem>>, vector<1x8x128xf32>
    %9 = vector.shape_cast %8 : vector<1x8x128xf32> to vector<8x128xf32>
    %c1_11 = arith.constant 1 : index
    %c0_12 = arith.constant 0 : index
    %c0_13 = arith.constant 0 : index
    %10 = vector.load %arg2[%c1_11, %c0_12, %c0_13] : memref<4x8x128xf32, #tpu.memory_space<vmem>>, vector<1x8x128xf32>
    %11 = vector.shape_cast %10 : vector<1x8x128xf32> to vector<8x128xf32>
    %c2_14 = arith.constant 2 : index
    %c0_15 = arith.constant 0 : index
    %c0_16 = arith.constant 0 : index
    %12 = vector.load %arg2[%c2_14, %c0_15, %c0_16] : memref<4x8x128xf32, #tpu.memory_space<vmem>>, vector<1x8x128xf32>
    %13 = vector.shape_cast %12 : vector<1x8x128xf32> to vector<8x128xf32>
    %c3_17 = arith.constant 3 : index
    %c0_18 = arith.constant 0 : index
    %c0_19 = arith.constant 0 : index
    %14 = vector.load %arg2[%c3_17, %c0_18, %c0_19] : memref<4x8x128xf32, #tpu.memory_space<vmem>>, vector<1x8x128xf32>
    %15 = vector.shape_cast %14 : vector<1x8x128xf32> to vector<8x128xf32>
    %16 = arith.minimumf %5, %13 : vector<8x128xf32>
    %17 = arith.maximumf %1, %9 : vector<8x128xf32>
    %18 = arith.subf %16, %17 : vector<8x128xf32>
    %cst = arith.constant 1.000000e+00 : f32
    %19 = vector.broadcast %cst : f32 to vector<8x128xf32>
    %20 = arith.addf %18, %19 : vector<8x128xf32>
    %cst_20 = arith.constant 0.000000e+00 : f32
    %21 = vector.broadcast %cst_20 : f32 to vector<8x128xf32>
    %22 = arith.maximumf %20, %21 : vector<8x128xf32>
    %23 = arith.minimumf %7, %15 : vector<8x128xf32>
    %24 = arith.maximumf %3, %11 : vector<8x128xf32>
    %25 = arith.subf %23, %24 : vector<8x128xf32>
    %cst_21 = arith.constant 1.000000e+00 : f32
    %26 = vector.broadcast %cst_21 : f32 to vector<8x128xf32>
    %27 = arith.addf %25, %26 : vector<8x128xf32>
    %cst_22 = arith.constant 0.000000e+00 : f32
    %28 = vector.broadcast %cst_22 : f32 to vector<8x128xf32>
    %29 = arith.maximumf %27, %28 : vector<8x128xf32>
    %30 = arith.mulf %22, %29 : vector<8x128xf32>
    %31 = arith.subf %5, %1 : vector<8x128xf32>
    %cst_23 = arith.constant 1.000000e+00 : f32
    %32 = vector.broadcast %cst_23 : f32 to vector<8x128xf32>
    %33 = arith.addf %31, %32 : vector<8x128xf32>
    %34 = arith.subf %7, %3 : vector<8x128xf32>
    %cst_24 = arith.constant 1.000000e+00 : f32
    %35 = vector.broadcast %cst_24 : f32 to vector<8x128xf32>
    %36 = arith.addf %34, %35 : vector<8x128xf32>
    %37 = arith.mulf %33, %36 : vector<8x128xf32>
    %38 = arith.subf %13, %9 : vector<8x128xf32>
    %cst_25 = arith.constant 1.000000e+00 : f32
    %39 = vector.broadcast %cst_25 : f32 to vector<8x128xf32>
    %40 = arith.addf %38, %39 : vector<8x128xf32>
    %41 = arith.subf %15, %11 : vector<8x128xf32>
    %cst_26 = arith.constant 1.000000e+00 : f32
    %42 = vector.broadcast %cst_26 : f32 to vector<8x128xf32>
    %43 = arith.addf %41, %42 : vector<8x128xf32>
    %44 = arith.mulf %40, %43 : vector<8x128xf32>
    %45 = arith.addf %37, %44 : vector<8x128xf32>
    %46 = arith.subf %45, %30 : vector<8x128xf32>
    %cst_27 = arith.constant 9.99999997E-7 : f32
    %47 = vector.broadcast %cst_27 : f32 to vector<8x128xf32>
    %48 = arith.addf %46, %47 : vector<8x128xf32>
    %49 = arith.divf %30, %48 : vector<8x128xf32>
    %50 = arith.maximumf %5, %13 : vector<8x128xf32>
    %51 = arith.minimumf %1, %9 : vector<8x128xf32>
    %52 = arith.subf %50, %51 : vector<8x128xf32>
    %cst_28 = arith.constant 1.000000e+00 : f32
    %53 = vector.broadcast %cst_28 : f32 to vector<8x128xf32>
    %54 = arith.addf %52, %53 : vector<8x128xf32>
    %cst_29 = arith.constant 0.000000e+00 : f32
    %55 = vector.broadcast %cst_29 : f32 to vector<8x128xf32>
    %56 = arith.maximumf %54, %55 : vector<8x128xf32>
    %57 = arith.maximumf %7, %15 : vector<8x128xf32>
    %58 = arith.minimumf %3, %11 : vector<8x128xf32>
    %59 = arith.subf %57, %58 : vector<8x128xf32>
    %cst_30 = arith.constant 1.000000e+00 : f32
    %60 = vector.broadcast %cst_30 : f32 to vector<8x128xf32>
    %61 = arith.addf %59, %60 : vector<8x128xf32>
    %cst_31 = arith.constant 0.000000e+00 : f32
    %62 = vector.broadcast %cst_31 : f32 to vector<8x128xf32>
    %63 = arith.maximumf %61, %62 : vector<8x128xf32>
    %64 = arith.mulf %56, %63 : vector<8x128xf32>
    %cst_32 = arith.constant 9.99999997E-7 : f32
    %65 = vector.broadcast %cst_32 : f32 to vector<8x128xf32>
    %66 = arith.addf %64, %65 : vector<8x128xf32>
    %67 = arith.subf %66, %48 : vector<8x128xf32>
    %68 = arith.divf %67, %66 : vector<8x128xf32>
    %69 = arith.subf %49, %68 : vector<8x128xf32>
    %cst_33 = arith.constant 1.000000e+00 : f32
    %70 = vector.broadcast %cst_33 : f32 to vector<8x128xf32>
    %71 = arith.subf %70, %69 : vector<8x128xf32>
    %c1024_i32 = arith.constant 1024 : i32
    %72 = arith.muli %arg0, %c1024_i32 : i32
    %73 = tpu.iota {dimensions = array<i32: 0>} : vector<8x128xi32>
    %74 = tpu.iota {dimensions = array<i32: 1>} : vector<8x128xi32>
    %c128_i32 = arith.constant 128 : i32
    %75 = vector.broadcast %c128_i32 : i32 to vector<8x128xi32>
    %76 = arith.muli %73, %75 : vector<8x128xi32>
    %77 = vector.broadcast %72 : i32 to vector<8x128xi32>
    %78 = arith.addi %77, %76 : vector<8x128xi32>
    %79 = arith.addi %78, %74 : vector<8x128xi32>
    %c8_i32 = arith.constant 8 : i32
    %80 = vector.broadcast %c8_i32 : i32 to vector<8x128xi32>
    %81 = arith.cmpi slt, %79, %80 : vector<8x128xi32>
    %cst_34 = arith.constant 0.000000e+00 : f32
    %82 = vector.broadcast %cst_34 : f32 to vector<8x128xf32>
    %83 = arith.select %81, %71, %82 : vector<8x128xi1>, vector<8x128xf32>
    %84 = vector.shape_cast %83 : vector<8x128xf32> to vector<1x8x128xf32>
    %cst_35 = arith.constant dense<0.000000e+00> : vector<8x128xf32>
    %85 = vector.multi_reduction <add>, %84, %cst_35 [0] : vector<1x8x128xf32> to vector<8x128xf32>
    %86 = vector.shape_cast %85 : vector<8x128xf32> to vector<1x8x128xf32>
    %c0_36 = arith.constant 0 : index
    %c0_37 = arith.constant 0 : index
    %c0_38 = arith.constant 0 : index
    %87 = vector.load %arg3[%c0_36, %c0_37, %c0_38] : memref<1x8x128xf32, #tpu.memory_space<vmem>>, vector<1x8x128xf32>
    tpu.vector_store %arg3[%c0_36, %c0_37, %c0_38], %86 {strides = array<i32>} : memref<1x8x128xf32, #tpu.memory_space<vmem>>, vector<1x8x128xf32>,
    return
  }
  func.func @transform_0(%arg0: i32) -> (i32, i32, i32) {
    %c0_i32 = arith.constant 0 : i32
    %c0_i32_0 = arith.constant 0 : i32
    %c0_i32_1 = arith.constant 0 : i32
    return %c0_i32, %arg0, %c0_i32_0 : i32, i32, i32
  }
  func.func @transform_1(%arg0: i32) -> (i32, i32, i32) {
    %c0_i32 = arith.constant 0 : i32
    %c0_i32_0 = arith.constant 0 : i32
    %c0_i32_1 = arith.constant 0 : i32
    return %c0_i32, %arg0, %c0_i32_0 : i32, i32, i32
  }
  func.func @transform_2(%arg0: i32) -> (i32, i32, i32) {
    %c0_i32 = arith.constant 0 : i32
    %c0_i32_0 = arith.constant 0 : i32
    %c0_i32_1 = arith.constant 0 : i32
    return %arg0, %c0_i32, %c0_i32_0 : i32, i32, i32
  }
}

</mosaic_0001>

<bundles_post_ra>
// kernel: tpu_custom_call.1
= control target key start
LH: loop header
LB: loop body
LE: loop exit
PB: predicated region body
PF: predicated region fallthrough
CT: control target
= control target key end

     0   :  { %7 = vsyncpa [#allocation3], 0  ;;  %s230_s0 = inlined_call_operand.hbm [shape: f32[4,8,128], index: 0, kind: input, shape index: {}]   ;;  %s231_s1 = inlined_call_operand.hbm [shape: f32[4,8,128], index: 1, kind: input, shape index: {}]   ;;  %s232_s2 = inlined_call_operand.hbm [shape: f32[1,8,128], index: 2, kind: output, shape index: {}]  }
   0x1   :  { %8 = vsyncpa [#allocation6], 0 }
   0x2   :  { %9 = vsyncpa [#allocation4], 0  ;;  %s201_s9 = smov [#allocation2]  }
   0x3   :  { %s15_s10 = sshll.u32 %s201_s9, 4  ;;  %s16_s10 = int_to_ptr.vmem [resolvable:$true] %s15_s10 }
   0x4   :  { %s143_s11 = scalar_lea.vmem %s16_s10, 512  ;;  %p148_p1 = scmp.lt.s32.totalorder %s16_s10, %s16_s10 }
   0x5   :  { %p144_p0 = scmp.ne.s32.totalorder %s16_s10, %s143_s11  ;;  %p149_p2 = scmp.lt.s32.totalorder %s143_s11, %s143_s11 }
   0x7   :  { %p150_p3 = por %p149_p2, %p148_p1 }
   0x9   :  { %p151_p4 = pnand %p150_p3, %p144_p0 }
   0xb   :  { %154 = shalt.err (!%p151_p4)
}
   0xc   :  { %s202_s12 = smov 128   ;;  %s203_s13 = smov 8  }
   0xd   :  { %21 = dma.hbm_to_vmem [thread:$0]  %s230_s0, 512, %s16_s10, [#allocation3], %s202_s12, %s202_s12, %s203_s13  }
   0xe   :  { %s204_s16 = smov [#allocation5]  }
   0xf   :  { %s27_s17 = sshll.u32 %s204_s16, 4  ;;  %s28_s17 = int_to_ptr.vmem [resolvable:$true] %s27_s17 }
  0x10   :  { %s163_s18 = scalar_lea.vmem %s28_s17, 512  ;;  %p168_p6 = scmp.lt.s32.totalorder %s28_s17, %s28_s17 }
  0x11   :  { %p164_p5 = scmp.ne.s32.totalorder %s28_s17, %s163_s18  ;;  %p169_p7 = scmp.lt.s32.totalorder %s163_s18, %s163_s18 }
  0x13   :  { %p170_p8 = por %p169_p7, %p168_p6 }
  0x15   :  { %p171_p9 = pnand %p170_p8, %p164_p5 }
  0x17   :  { %174 = shalt.err (!%p171_p9)
}
  0x18   :  { %33 = dma.hbm_to_vmem [thread:$0]  %s231_s1, 512, %s28_s17, [#allocation6], %s202_s12, %s202_s12, %s203_s13  }
  0x19   :  { %195 = dma.done.wait [#allocation3], 512  }
  0x1a   :  { %196 = vsyncadd [#allocation3], 4294966784 }
  0x1b   :  { %197 = dma.done.wait [#allocation6], 512  }
  0x1c   :  { %198 = vsyncadd [#allocation6], 4294966784  ;;  %v40_v0 = vld [vmem:[#allocation2] sm:$0xff]  ;;  %v42_v1 = vld [vmem:[#allocation2 + $0x8] sm:$0xff]  ;;  %v98_v44 = vlaneseq  ;;  %s205_s0 = smov [#allocation7]  }
  0x1d   :  { %v44_v2 = vld [vmem:[#allocation2 + $0x10] sm:$0xff]  ;;  %v46_v3 = vld [vmem:[#allocation2 + $0x18] sm:$0xff]  ;;  %v47_v4 = vld [vmem:[#allocation5] sm:$0xff]  ;;  %s116_s1 = sshll.u32 %s205_s0, 4  ;;  %s117_s1 = int_to_ptr.vmem [resolvable:$true] %s116_s1 }
  0x1e   :  { %v49_v5 = vld [vmem:[#allocation5 + $0x8] sm:$0xff]  ;;  %v65_v6 = vsub.f32 %v44_v2, %v40_v0  ;;  %v51_v7 = vld [vmem:[#allocation5 + $0x10] sm:$0xff]  ;;  %v53_v8 = vld [vmem:[#allocation5 + $0x18] sm:$0xff]  ;;  %v55_v9 = vmax.f32 %v40_v0, %v47_v4  ;;  %v67_v11 = vsub.f32 %v46_v3, %v42_v1  ;;  %v81_v12 = vmin.f32 %v40_v0, %v47_v4  ;;  %s175_s21 = scalar_lea.vmem %s117_s1, 128  ;;  %p180_p11 = scmp.lt.s32.totalorder %s117_s1, %s117_s1 }
  0x1f   :  { %v60_v10 = vmax.f32 %v42_v1, %v49_v5  ;;  %v54_v13 = vmin.f32 %v44_v2, %v51_v7  ;;  %v59_v14 = vmin.f32 %v46_v3, %v53_v8  ;;  %v70_v16 = vsub.f32 %v51_v7, %v47_v4  ;;  %p176_p10 = scmp.ne.s32.totalorder %s117_s1, %s175_s21  ;;  %p181_p12 = scmp.lt.s32.totalorder %s175_s21, %s175_s21 }
  0x20   :  { %v66_v15 = vadd.f32 1.0, %v65_v6  ;;  %v68_v17 = vadd.f32 1.0, %v67_v11  ;;  %v72_v18 = vsub.f32 %v53_v8, %v49_v5  ;;  %v80_v19 = vmax.f32 %v44_v2, %v51_v7 }
  0x21   :  { %v85_v20 = vmax.f32 %v46_v3, %v53_v8  ;;  %v56_v21 = vsub.f32 %v54_v13, %v55_v9  ;;  %v61_v22 = vsub.f32 %v59_v14, %v60_v10  ;;  %v71_v23 = vadd.f32 1.0, %v70_v16  ;;  %p182_p13 = por %p181_p12, %p180_p11 }
  0x22   :  { %v86_v24 = vmin.f32 %v42_v1, %v49_v5  ;;  %v69_v25 = vmul.f32 %v68_v17, %v66_v15  ;;  %v73_v26 = vadd.f32 1.0, %v72_v18  ;;  %v82_v27 = vsub.f32 %v80_v19, %v81_v12 }
  0x23   :  { %v57_v28 = vadd.f32 1.0, %v56_v21  ;;  %v62_v29 = vadd.f32 1.0, %v61_v22  ;;  %v99_v45 = vshrl.u32 %v98_v44, 7  ;;  %v101_v46 = vand.u32 127, %v98_v44  ;;  %p183_p0 = pnand %p182_p13, %p176_p10 }
  0x24   :  { %v87_v30 = vsub.f32 %v85_v20, %v86_v24  ;;  %v74_v31 = vmul.f32 %v73_v26, %v71_v23  ;;  %v83_v32 = vadd.f32 1.0, %v82_v27 }
  0x25   :  { %v58_v33 = vmax.f32 %v57_v28, 0.0  ;;  %v63_v34 = vmax.f32 %v62_v29, 0.0  ;;  %v102_v47 = vmul.u32 128, %v99_v45 }
  0x26   :  { %v88_v35 = vadd.f32 1.0, %v87_v30  ;;  %v75_v36 = vadd.f32 %v74_v31, %v69_v25  ;;  %v84_v37 = vmax.f32 %v83_v32, 0.0 }
  0x27   :  { %v64_v38 = vmul.f32 %v63_v34, %v58_v33  ;;  %v105_v52 = vadd.s32 %v102_v47, %v101_v46 }
  0x28   :  { %v89_v39 = vmax.f32 %v88_v35, 0.0 }
  0x29   :  { %v76_v40 = vsub.f32 %v75_v36, %v64_v38  ;;  %vm106_vm0 = vcmp.lt.s32.totalorder %v105_v52, 8 }
  0x2a   :  { %v90_v41 = vmul.f32 %v89_v39, %v84_v37 }
  0x2b   :  { %v77_v42 = vadd.f32 1e-06, %v76_v40 }
  0x2c   :  { %v91_v43 = vadd.f32 1e-06, %v90_v41 }
  0x2d   :  { %131 = vrcp.f32 %v77_v42 }
  0x2e   :  { %133 = vrcp.f32 %v91_v43  ;;  %v92_v48 = vsub.f32 %v91_v43, %v77_v42 }
  0x3a   :  { %v132_v49 = vpop.eup %131 }
  0x3b   :  { %v134_v50 = vpop.eup %133  ;;  %v79_v51 = vmul.f32 %v132_v49, %v64_v38 }
  0x3c   :  { %v94_v53 = vmul.f32 %v134_v50, %v92_v48 }
  0x3e   :  { %v95_v54 = vsub.f32 %v79_v51, %v94_v53 }
  0x40   :  { %v96_v55 = vsub.f32 1.0, %v95_v54 }
  0x42   :  { %v107_v56 = vsel %vm106_vm0, %v96_v55, 0.0 }
  0x43   :  { %109 = vst [vmem:[#allocation7] sm:$0xff] %v107_v56 }
  0x44   :  { %186 = shalt.err (!%p183_p0)
}
  0x45   :  { %119 = dma.vmem_to_hbm [thread:$0]  %s117_s1, 128, %s232_s2, [#allocation4]  }
  0x46   :  { %199 = dma.done.wait [#allocation4], 128  }
  0x47   :  { %200 = vsyncadd [#allocation4], 4294967168 }
  0x48   :  { %123 = vsyncpa [#allocation3], 1 }
  0x49   :  { %124 = vsyncpa [#allocation6], 1 }
  0x4a   :  { %125 = vsyncpa [#allocation4], 1 }

</bundles_post_ra>
